<compile_context>
chip_gen: v7x
topology: tpu7x:2x2x1
jax: 0.10.0
libtpu: 0.0.40
codegen_flags: <defaults>
</compile_context>

<pallas_src>
import functools

import jax
import jax.numpy as jnp
from jax.experimental import pallas as pl
from jax.experimental.pallas import tpu as pltpu


# ----------------------------- configuration ------------------------------ #
EMBED = 32
HEADS = 4
HEAD_DIM = EMBED // HEADS
SEQ = 8


# ------------------------------ Pallas kernel ----------------------------- #
def self_attention_kernel(v_ref, k_ref, q_ref, wqkv_ref, wo_ref, bo_ref,
                          out_ref, *, heads, head_dim, embed):
    """Full SelfAttention forward, everything resident in VMEM (no grid)."""
    seq = q_ref.shape[0]
    scale = 1.0 / (float(embed) ** 0.5)  # NOTE: sqrt(embed_size), per the module

    # ---- fused QKV projection: one wide (3S, E) @ (E, 3E) MXU pass ---------
    # Row-concat in VMEM (no per-call HBM stacking in the wrapper).
    x = jnp.concatenate(
        [v_ref[...], k_ref[...], q_ref[...]], axis=0).astype(jnp.float32)   # (3S, E)
    wqkv = wqkv_ref[...].astype(jnp.float32)                                # (E, 3E) = [Wv|Wk|Wq]
    proj = jnp.dot(x, wqkv, preferred_element_type=jnp.float32)             # (3S, 3E)

    # Diagonal blocks: each input against its own weight.
    v = proj[0:seq,           0:embed]                                      # values @ Wv
    k = proj[seq:2 * seq,     embed:2 * embed]                              # keys   @ Wk
    q = proj[2 * seq:3 * seq, 2 * embed:3 * embed] * scale                  # query  @ Wq (pre-scaled)

    # ---- head-batched attention: (H, S, d) with H as a dot_general batch dim
    def split_heads(t):  # (S, E) -> (H, S, d) via lane slices + leading-dim stack
        return jnp.stack(
            [t[:, h * head_dim:(h + 1) * head_dim] for h in range(heads)], axis=0)

    qh = split_heads(q)                                                     # (H, S, d)
    kh = split_heads(k)                                                     # (H, S, d)
    vh = split_heads(v)                                                     # (H, S, d)

    # energy[h, q, k] = sum_d qh[h,q,d] * kh[h,k,d]   (no explicit transpose)
    energy = jnp.einsum('hqd,hkd->hqk', qh, kh,
                        preferred_element_type=jnp.float32)                 # (H, S, S)

    # One softmax over all heads at once (numerically stable, exact divide).
    m = jnp.max(energy, axis=-1, keepdims=True)
    p = jnp.exp(energy - m)
    attn = p / jnp.sum(p, axis=-1, keepdims=True)                           # (H, S, S)

    # P @ V, head-batched.
    o = jnp.einsum('hqk,hkd->hqd', attn, vh,
                   preferred_element_type=jnp.float32)                      # (H, S, d)

    # Merge heads back to (S, E) via lane concat, then ONE output projection.
    o_cat = jnp.concatenate([o[h] for h in range(heads)], axis=-1)          # (S, E)
    wo = wo_ref[...].astype(jnp.float32)                                    # (E, E)
    out = jnp.dot(o_cat, wo, preferred_element_type=jnp.float32) + bo_ref[...]
    out_ref[...] = out.astype(out_ref.dtype)


# -------------------------------- wrapper ---------------------------------- #
@jax.jit
def self_attention(values, keys, query, wqkv, wo, bo):
    """SelfAttention.forward(values, keys, query) as a single Pallas call.

    `wqkv` is the init-time concatenation [Wv | Wk | Wq] of shape (E, 3E); it is
    built once outside this jitted function (constant across calls).
    """
    # TODO(synk): assumes value_len == key_len == query_len (true for the
    #             layer(x, x, x) self-attention usage); ragged lengths would
    #             need separate projection matmuls.
    S, E = query.shape
    vmem = pl.BlockSpec(memory_space=pltpu.MemorySpace.VMEM)
    kernel = functools.partial(self_attention_kernel,
                               heads=HEADS, head_dim=HEAD_DIM, embed=EMBED)
    return pl.pallas_call(
        kernel,
        out_shape=jax.ShapeDtypeStruct((S, E), query.dtype),
        in_specs=[vmem, vmem, vmem, vmem, vmem, vmem],
        out_specs=vmem,
    )(values, keys, query, wqkv, wo, bo)


# ----------------------------- pure-JAX reference -------------------------- #
def reference_self_attention(values, keys, query, wv, wk, wq, wo, bo):
    v = values @ wv
    k = keys @ wk
    q = query @ wq
    Sq = query.shape[0]
    vh = v.reshape(-1, HEADS, HEAD_DIM)
    kh = k.reshape(-1, HEADS, HEAD_DIM)
    qh = q.reshape(Sq, HEADS, HEAD_DIM)
    energy = jnp.einsum('qhd,khd->hqk', qh, kh)
    attn = jax.nn.softmax(energy / jnp.sqrt(jnp.float32(EMBED)), axis=2)
    out = jnp.einsum('hql,lhd->qhd', attn, vh).reshape(Sq, EMBED)
    return out @ wo + bo


# ----------------------------------- main ---------------------------------- #
if __name__ == "__main__":
    key = jax.random.PRNGKey(0)
    kv, kk, kq, kw = jax.random.split(key, 4)

    values = jax.random.normal(kv, (SEQ, EMBED), dtype=jnp.float32)
    keys_in = jax.random.normal(kk, (SEQ, EMBED), dtype=jnp.float32)
    query = jax.random.normal(kq, (SEQ, EMBED), dtype=jnp.float32)

    wkeys = jax.random.split(kw, 5)
    scale = 0.2
    wv = (scale * jax.random.normal(wkeys[0], (EMBED, EMBED))).astype(jnp.float32)
    wk = (scale * jax.random.normal(wkeys[1], (EMBED, EMBED))).astype(jnp.float32)
    wq = (scale * jax.random.normal(wkeys[2], (EMBED, EMBED))).astype(jnp.float32)
    wo = (scale * jax.random.normal(wkeys[3], (EMBED, EMBED))).astype(jnp.float32)
    bo = (scale * jax.random.normal(wkeys[4], (1, EMBED))).astype(jnp.float32)

    # Init-time weight fusion (done ONCE, outside the jitted per-call path).
    wqkv = jnp.concatenate([wv, wk, wq], axis=1)          # (E, 3E) = [Wv | Wk | Wq]

    out = self_attention(values, keys_in, query, wqkv, wo, bo)
    out = jax.block_until_ready(out)

    ref = jax.block_until_ready(
        reference_self_attention(values, keys_in, query, wv, wk, wq, wo, bo))

    assert out.shape == (SEQ, EMBED)
    assert jnp.allclose(out, ref, atol=2e-3, rtol=2e-3), "mismatch vs reference"

    print("KERNEL_OK")
</pallas_src>

<mosaic_0001>
module attributes {stable_mosaic.version = 11 : i64} {
  func.func @self_attention_kernel(%arg0: memref<8x32xf32, #tpu.memory_space<vmem>>, %arg1: memref<8x32xf32, #tpu.memory_space<vmem>>, %arg2: memref<8x32xf32, #tpu.memory_space<vmem>>, %arg3: memref<32x96xf32, #tpu.memory_space<vmem>>, %arg4: memref<32x32xf32, #tpu.memory_space<vmem>>, %arg5: memref<1x32xf32, #tpu.memory_space<vmem>>, %arg6: memref<8x32xf32, #tpu.memory_space<vmem>>) attributes {dimension_semantics = [], scalar_prefetch = 0 : i64, scratch_operands = 0 : i64, tpu.core_type = #tpu.core_type<tc>} {
    %c0 = arith.constant 0 : index
    %c0_0 = arith.constant 0 : index
    %0 = vector.load %arg0[%c0, %c0_0] : memref<8x32xf32, #tpu.memory_space<vmem>>, vector<8x32xf32>
    %c0_1 = arith.constant 0 : index
    %c0_2 = arith.constant 0 : index
    %1 = vector.load %arg1[%c0_1, %c0_2] : memref<8x32xf32, #tpu.memory_space<vmem>>, vector<8x32xf32>
    %c0_3 = arith.constant 0 : index
    %c0_4 = arith.constant 0 : index
    %2 = vector.load %arg2[%c0_3, %c0_4] : memref<8x32xf32, #tpu.memory_space<vmem>>, vector<8x32xf32>
    %3 = tpu.concatenate %0, %1, %2 in 0 : vector<8x32xf32>, vector<8x32xf32>, vector<8x32xf32> -> vector<24x32xf32>
    %c0_5 = arith.constant 0 : index
    %c0_6 = arith.constant 0 : index
    %4 = vector.load %arg3[%c0_5, %c0_6] : memref<32x96xf32, #tpu.memory_space<vmem>>, vector<32x96xf32>
    %cst = arith.constant dense<0.000000e+00> : vector<24x96xf32>
    %5 = tpu.matmul %3, %4, %cst {dimension_numbers = #tpu.dot_dimension_numbers<[1], [0], [0], [1], [0, 0, 1, 1], [], []>} : vector<24x32xf32>, vector<32x96xf32>, vector<24x96xf32> -> vector<24x96xf32>
    %6 = vector.extract_strided_slice %5 {offsets = [0, 0], sizes = [8, 32], strides = [1, 1]} : vector<24x96xf32> to vector<8x32xf32>
    %7 = vector.extract_strided_slice %5 {offsets = [8, 32], sizes = [8, 32], strides = [1, 1]} : vector<24x96xf32> to vector<8x32xf32>
    %8 = vector.extract_strided_slice %5 {offsets = [16, 64], sizes = [8, 32], strides = [1, 1]} : vector<24x96xf32> to vector<8x32xf32>
    %cst_7 = arith.constant 0.176776692 : f32
    %9 = vector.broadcast %cst_7 : f32 to vector<8x32xf32>
    %10 = arith.mulf %8, %9 : vector<8x32xf32>
    %11 = vector.extract_strided_slice %10 {offsets = [0, 0], sizes = [8, 8], strides = [1, 1]} : vector<8x32xf32> to vector<8x8xf32>
    %12 = vector.extract_strided_slice %10 {offsets = [0, 8], sizes = [8, 8], strides = [1, 1]} : vector<8x32xf32> to vector<8x8xf32>
    %13 = vector.extract_strided_slice %10 {offsets = [0, 16], sizes = [8, 8], strides = [1, 1]} : vector<8x32xf32> to vector<8x8xf32>
    %14 = vector.extract_strided_slice %10 {offsets = [0, 24], sizes = [8, 8], strides = [1, 1]} : vector<8x32xf32> to vector<8x8xf32>
    %15 = vector.shape_cast %11 : vector<8x8xf32> to vector<1x8x8xf32>
    %16 = vector.shape_cast %12 : vector<8x8xf32> to vector<1x8x8xf32>
    %17 = vector.shape_cast %13 : vector<8x8xf32> to vector<1x8x8xf32>
    %18 = vector.shape_cast %14 : vector<8x8xf32> to vector<1x8x8xf32>
    %19 = tpu.concatenate %15, %16, %17, %18 in 0 : vector<1x8x8xf32>, vector<1x8x8xf32>, vector<1x8x8xf32>, vector<1x8x8xf32> -> vector<4x8x8xf32>
    %20 = vector.extract_strided_slice %7 {offsets = [0, 0], sizes = [8, 8], strides = [1, 1]} : vector<8x32xf32> to vector<8x8xf32>
    %21 = vector.extract_strided_slice %7 {offsets = [0, 8], sizes = [8, 8], strides = [1, 1]} : vector<8x32xf32> to vector<8x8xf32>
    %22 = vector.extract_strided_slice %7 {offsets = [0, 16], sizes = [8, 8], strides = [1, 1]} : vector<8x32xf32> to vector<8x8xf32>
    %23 = vector.extract_strided_slice %7 {offsets = [0, 24], sizes = [8, 8], strides = [1, 1]} : vector<8x32xf32> to vector<8x8xf32>
    %24 = vector.shape_cast %20 : vector<8x8xf32> to vector<1x8x8xf32>
    %25 = vector.shape_cast %21 : vector<8x8xf32> to vector<1x8x8xf32>
    %26 = vector.shape_cast %22 : vector<8x8xf32> to vector<1x8x8xf32>
    %27 = vector.shape_cast %23 : vector<8x8xf32> to vector<1x8x8xf32>
    %28 = tpu.concatenate %24, %25, %26, %27 in 0 : vector<1x8x8xf32>, vector<1x8x8xf32>, vector<1x8x8xf32>, vector<1x8x8xf32> -> vector<4x8x8xf32>
    %29 = vector.extract_strided_slice %6 {offsets = [0, 0], sizes = [8, 8], strides = [1, 1]} : vector<8x32xf32> to vector<8x8xf32>
    %30 = vector.extract_strided_slice %6 {offsets = [0, 8], sizes = [8, 8], strides = [1, 1]} : vector<8x32xf32> to vector<8x8xf32>
    %31 = vector.extract_strided_slice %6 {offsets = [0, 16], sizes = [8, 8], strides = [1, 1]} : vector<8x32xf32> to vector<8x8xf32>
    %32 = vector.extract_strided_slice %6 {offsets = [0, 24], sizes = [8, 8], strides = [1, 1]} : vector<8x32xf32> to vector<8x8xf32>
    %33 = vector.shape_cast %29 : vector<8x8xf32> to vector<1x8x8xf32>
    %34 = vector.shape_cast %30 : vector<8x8xf32> to vector<1x8x8xf32>
    %35 = vector.shape_cast %31 : vector<8x8xf32> to vector<1x8x8xf32>
    %36 = vector.shape_cast %32 : vector<8x8xf32> to vector<1x8x8xf32>
    %37 = tpu.concatenate %33, %34, %35, %36 in 0 : vector<1x8x8xf32>, vector<1x8x8xf32>, vector<1x8x8xf32>, vector<1x8x8xf32> -> vector<4x8x8xf32>
    "tpu.trace_start"() <{level = 10 : i32, message = "hqd,hkd->hqk"}> : () -> ()
    %cst_8 = arith.constant dense<0.000000e+00> : vector<4x8x8xf32>
    %38 = tpu.matmul %19, %28, %cst_8 {dimension_numbers = #tpu.dot_dimension_numbers<[2], [2], [1], [1], [0, 0, 0, 1, 1, 1], [0], [0]>} : vector<4x8x8xf32>, vector<4x8x8xf32>, vector<4x8x8xf32> -> vector<4x8x8xf32>
    "tpu.trace_stop"() : () -> ()
    %cst_9 = arith.constant dense<0xFF800000> : vector<4x8xf32>
    %39 = vector.multi_reduction <maximumf>, %38, %cst_9 [2] : vector<4x8x8xf32> to vector<4x8xf32>
    %40 = vector.shape_cast %39 : vector<4x8xf32> to vector<4x8x1xf32>
    %41 = vector.broadcast %40 : vector<4x8x1xf32> to vector<4x8x8xf32>
    %42 = arith.subf %38, %41 : vector<4x8x8xf32>
    %43 = math.exp %42 : vector<4x8x8xf32>
    %cst_10 = arith.constant dense<0.000000e+00> : vector<4x8xf32>
    %44 = vector.multi_reduction <add>, %43, %cst_10 [2] : vector<4x8x8xf32> to vector<4x8xf32>
    %45 = vector.shape_cast %44 : vector<4x8xf32> to vector<4x8x1xf32>
    %46 = vector.broadcast %45 : vector<4x8x1xf32> to vector<4x8x8xf32>
    %47 = arith.divf %43, %46 : vector<4x8x8xf32>
    "tpu.trace_start"() <{level = 10 : i32, message = "hqk,hkd->hqd"}> : () -> ()
    %cst_11 = arith.constant dense<0.000000e+00> : vector<4x8x8xf32>
    %48 = tpu.matmul %47, %37, %cst_11 {dimension_numbers = #tpu.dot_dimension_numbers<[2], [1], [1], [2], [0, 0, 0, 1, 1, 2], [0], [0]>} : vector<4x8x8xf32>, vector<4x8x8xf32>, vector<4x8x8xf32> -> vector<4x8x8xf32>
    "tpu.trace_stop"() : () -> ()
    %49 = vector.extract_strided_slice %48 {offsets = [0, 0, 0], sizes = [1, 8, 8], strides = [1, 1, 1]} : vector<4x8x8xf32> to vector<1x8x8xf32>
    %50 = vector.shape_cast %49 : vector<1x8x8xf32> to vector<8x8xf32>
    %51 = vector.extract_strided_slice %48 {offsets = [1, 0, 0], sizes = [1, 8, 8], strides = [1, 1, 1]} : vector<4x8x8xf32> to vector<1x8x8xf32>
    %52 = vector.shape_cast %51 : vector<1x8x8xf32> to vector<8x8xf32>
    %53 = vector.extract_strided_slice %48 {offsets = [2, 0, 0], sizes = [1, 8, 8], strides = [1, 1, 1]} : vector<4x8x8xf32> to vector<1x8x8xf32>
    %54 = vector.shape_cast %53 : vector<1x8x8xf32> to vector<8x8xf32>
    %55 = vector.extract_strided_slice %48 {offsets = [3, 0, 0], sizes = [1, 8, 8], strides = [1, 1, 1]} : vector<4x8x8xf32> to vector<1x8x8xf32>
    %56 = vector.shape_cast %55 : vector<1x8x8xf32> to vector<8x8xf32>
    %57 = tpu.concatenate %50, %52, %54, %56 in 1 : vector<8x8xf32>, vector<8x8xf32>, vector<8x8xf32>, vector<8x8xf32> -> vector<8x32xf32>
    %c0_12 = arith.constant 0 : index
    %c0_13 = arith.constant 0 : index
    %58 = vector.load %arg4[%c0_12, %c0_13] : memref<32x32xf32, #tpu.memory_space<vmem>>, vector<32x32xf32>
    %cst_14 = arith.constant dense<0.000000e+00> : vector<8x32xf32>
    %59 = tpu.matmul %57, %58, %cst_14 {dimension_numbers = #tpu.dot_dimension_numbers<[1], [0], [0], [1], [0, 0, 1, 1], [], []>} : vector<8x32xf32>, vector<32x32xf32>, vector<8x32xf32> -> vector<8x32xf32>
    %c0_15 = arith.constant 0 : index
    %c0_16 = arith.constant 0 : index
    %60 = vector.load %arg5[%c0_15, %c0_16] : memref<1x32xf32, #tpu.memory_space<vmem>>, vector<1x32xf32>
    %61 = vector.broadcast %60 : vector<1x32xf32> to vector<8x32xf32>
    %62 = arith.addf %59, %61 : vector<8x32xf32>
    %c0_17 = arith.constant 0 : index
    %c0_18 = arith.constant 0 : index
    %63 = vector.load %arg6[%c0_17, %c0_18] : memref<8x32xf32, #tpu.memory_space<vmem>>, vector<8x32xf32>
    tpu.vector_store %arg6[%c0_17, %c0_18], %62 {strides = array<i32>} : memref<8x32xf32, #tpu.memory_space<vmem>>, vector<8x32xf32>,
    return
  }
}

</mosaic_0001>

<bundles_post_ra>
// kernel: self_attention.1
= control target key start
LH: loop header
LB: loop body
LE: loop exit
PB: predicated region body
PF: predicated region fallthrough
CT: control target
= control target key end

     0   :  { %11 = vsyncpa [#allocation3], 0  ;;  %s1494_s0 = inlined_call_operand.hbm [shape: f32[8,32], index: 0, kind: input, shape index: {}]   ;;  %s1495_s1 = inlined_call_operand.hbm [shape: f32[8,32], index: 1, kind: input, shape index: {}]   ;;  %s1496_s2 = inlined_call_operand.hbm [shape: f32[8,32], index: 2, kind: input, shape index: {}]   ;;  %s1497_s3 = inlined_call_operand.hbm [shape: f32[32,96], index: 3, kind: input, shape index: {}]   ;;  %s1498_s4 = inlined_call_operand.hbm [shape: f32[32,32], index: 4, kind: input, shape index: {}]   ;;  %s1499_s5 = inlined_call_operand.vmem [shape: f32[1,32], index: 5, kind: input, shape index: {}]   ;;  %s1500_s6 = inlined_call_operand.hbm [shape: f32[8,32], index: 6, kind: output, shape index: {}]  }
   0x1   :  { %12 = vsyncpa [#allocation6], 0 }
   0x2   :  { %13 = vsyncpa [#allocation9], 0 }
   0x3   :  { %14 = vsyncpa [#allocation4], 0  ;;  %s1275_s21 = smov [#allocation5]   ;;  %s1276_s23 = smov [#allocation8]  }
   0x4   :  { %s31_s22 = sshll.u32 %s1275_s21, 4  ;;  %s50_s24 = sshll.u32 %s1276_s23, 4  ;;  %s32_s22 = int_to_ptr.vmem [resolvable:$true] %s31_s22  ;;  %s1328_s24 = int_to_ptr.vmem [resolvable:$true] %s50_s24 }
   0x5   :  { %s1135_s27 = scalar_lea.hbm %s1495_s1, 128 }
   0x6   :  { %p1136_p0 = scmp.ne.s32.totalorder %s1495_s1, %s1135_s27  ;;  %p1139_p1 = scmp.lt.u32.totalorder %s1135_s27, %s1495_s1 }
   0x8   :  { %p1141_p2 = pnand %p1139_p1, %p1136_p0 }
   0xa   :  { %1144 = shalt.err (!%p1141_p2)
}
   0xb   :  { %s1145_s8 = scalar_lea.vmem %s32_s22, 128  ;;  %p1150_p4 = scmp.lt.s32.totalorder %s32_s22, %s32_s22 }
   0xc   :  { %p1146_p3 = scmp.ne.s32.totalorder %s32_s22, %s1145_s8  ;;  %p1151_p5 = scmp.lt.s32.totalorder %s1145_s8, %s1145_s8 }
   0xe   :  { %p1152_p6 = por %p1151_p5, %p1150_p4 }
  0x10   :  { %p1153_p7 = pnand %p1152_p6, %p1146_p3 }
  0x12   :  { %1156 = shalt.err (!%p1153_p7)
}
  0x13   :  { %34 = dma.hbm_to_vmem [thread:$0]  %s1495_s1, 128, %s32_s22, [#allocation6]  }
  0x14   :  { %s1157_s13 = scalar_lea.hbm %s1497_s3, 512 }
  0x15   :  { %p1158_p8 = scmp.ne.s32.totalorder %s1497_s3, %s1157_s13  ;;  %p1161_p9 = scmp.lt.u32.totalorder %s1157_s13, %s1497_s3 }
  0x17   :  { %p1163_p10 = pnand %p1161_p9, %p1158_p8 }
  0x19   :  { %1166 = shalt.err (!%p1163_p10)
}
  0x1a   :  { %s1167_s18 = scalar_lea.vmem %s1328_s24, 512  ;;  %p1172_p12 = scmp.lt.s32.totalorder %s1328_s24, %s1328_s24 }
  0x1b   :  { %p1168_p11 = scmp.ne.s32.totalorder %s1328_s24, %s1167_s18  ;;  %p1173_p13 = scmp.lt.s32.totalorder %s1167_s18, %s1167_s18 }
  0x1d   :  { %p1174_p0 = por %p1173_p13, %p1172_p12 }
  0x1f   :  { %p1175_p1 = pnand %p1174_p0, %p1168_p11 }
  0x21   :  { %1178 = shalt.err (!%p1175_p1)
}
  0x22   :  { %s1277_s1 = smov 128   ;;  %s1278_s19 = smov 8  }
  0x23   :  { %56 = dma.hbm_to_vmem [thread:$0]  %s1497_s3, 512, %s1328_s24, [#allocation9], %s1277_s1, %s1277_s1, %s1278_s19  }
  0x24   :  { %s1279_s22 = smov [#allocation2]   ;;  %s1280_s25 = smov [#allocation7]  }
  0x25   :  { %s21_s23 = sshll.u32 %s1279_s22, 4  ;;  %s41_s26 = sshll.u32 %s1280_s25, 4  ;;  %s22_s23 = int_to_ptr.vmem [resolvable:$true] %s21_s23  ;;  %s42_s26 = int_to_ptr.vmem [resolvable:$true] %s41_s26 }
  0x26   :  { %s1179_s29 = scalar_lea.hbm %s1494_s0, 128 }
  0x27   :  { %p1180_p2 = scmp.ne.s32.totalorder %s1494_s0, %s1179_s29  ;;  %p1183_p3 = scmp.lt.u32.totalorder %s1179_s29, %s1494_s0 }
  0x29   :  { %p1185_p4 = pnand %p1183_p3, %p1180_p2 }
  0x2b   :  { %1188 = shalt.err (!%p1185_p4)
}
  0x2c   :  { %s1189_s3 = scalar_lea.vmem %s22_s23, 128  ;;  %p1194_p6 = scmp.lt.s32.totalorder %s22_s23, %s22_s23 }
  0x2d   :  { %p1190_p5 = scmp.ne.s32.totalorder %s22_s23, %s1189_s3  ;;  %p1195_p7 = scmp.lt.s32.totalorder %s1189_s3, %s1189_s3 }
  0x2f   :  { %p1196_p8 = por %p1195_p7, %p1194_p6 }
  0x31   :  { %p1197_p9 = pnand %p1196_p8, %p1190_p5 }
  0x33   :  { %1200 = shalt.err (!%p1197_p9)
}
  0x34   :  { %24 = dma.hbm_to_vmem [thread:$0]  %s1494_s0, 128, %s22_s23, [#allocation3]  }
  0x35   :  { %s1201_s13 = scalar_lea.hbm %s1496_s2, 128 }
  0x36   :  { %p1202_p10 = scmp.ne.s32.totalorder %s1496_s2, %s1201_s13  ;;  %p1205_p11 = scmp.lt.u32.totalorder %s1201_s13, %s1496_s2 }
  0x38   :  { %p1207_p12 = pnand %p1205_p11, %p1202_p10 }
  0x3a   :  { %1210 = shalt.err (!%p1207_p12)
}
  0x3b   :  { %s1211_s18 = scalar_lea.vmem %s42_s26, 128  ;;  %p1216_p0 = scmp.lt.s32.totalorder %s42_s26, %s42_s26 }
  0x3c   :  { %p1212_p13 = scmp.ne.s32.totalorder %s42_s26, %s1211_s18  ;;  %p1217_p1 = scmp.lt.s32.totalorder %s1211_s18, %s1211_s18 }
  0x3e   :  { %p1218_p2 = por %p1217_p1, %p1216_p0 }
  0x40   :  { %p1219_p3 = pnand %p1218_p2, %p1212_p13 }
  0x42   :  { %1222 = shalt.err (!%p1219_p3)
}
  0x43   :  { %44 = dma.hbm_to_vmem [thread:$0]  %s1496_s2, 128, %s42_s26, [#allocation6]  }
  0x44   :  { %s1281_s21 = smov [#allocation10]   ;;  %s1223_s27 = scalar_lea.hbm %s1498_s4, 512 }
  0x45   :  { %s62_s22 = sshll.u32 %s1281_s21, 4  ;;  %p1224_p4 = scmp.ne.s32.totalorder %s1498_s4, %s1223_s27  ;;  %s63_s22 = int_to_ptr.vmem [resolvable:$true] %s62_s22 }
  0x46   :  { %p1227_p5 = scmp.lt.u32.totalorder %s1223_s27, %s1498_s4 }
  0x48   :  { %p1229_p6 = pnand %p1227_p5, %p1224_p4 }
  0x4a   :  { %1232 = shalt.err (!%p1229_p6)
}
  0x4b   :  { %s1233_s8 = scalar_lea.vmem %s63_s22, 512  ;;  %p1238_p8 = scmp.lt.s32.totalorder %s63_s22, %s63_s22 }
  0x4c   :  { %p1234_p7 = scmp.ne.s32.totalorder %s63_s22, %s1233_s8  ;;  %p1239_p9 = scmp.lt.s32.totalorder %s1233_s8, %s1233_s8 }
  0x4e   :  { %p1240_p10 = por %p1239_p9, %p1238_p8 }
  0x50   :  { %p1241_p11 = pnand %p1240_p10, %p1234_p7 }
  0x52   :  { %1244 = shalt.err (!%p1241_p11)
}
  0x53   :  { %68 = dma.hbm_to_vmem [thread:$0]  %s1498_s4, 512, %s63_s22, [#allocation9], %s1277_s1, %s1277_s1, %s1278_s19  }
  0x54   :  { %1267 = dma.done.wait [#allocation3], 128  }
  0x55   :  { %1268 = vsyncadd [#allocation3], 4294967168 }
  0x56   :  { %1269 = dma.done.wait [#allocation6], 256  }
  0x57   :  { %1270 = vsyncadd [#allocation6], 4294967040 }
  0x58   :  { %1271 = dma.done.wait [#allocation9], 1024  }
  0x59   :  { %1272 = vsyncadd [#allocation9], 4294966272  ;;  %v1282_v0 = vmov 0.0|0.0   ;;  %vm1283_vm0 = vmmov 0   ;;  %v1284_v1 = vmov 0.0   ;;  %v89_v2 = vld [vmem:[#allocation8] sm:$0xff] }
  0x5a   :  { %1089 = vmatprep.subr.bf16.mxu0 %v1282_v0  ;;  %1029 = vmatprep.mubr.msk.f32.mxu0 %vm1283_vm0, %v1284_v1  ;;  %v90_v3 = vld [vmem:[#allocation8 + $0x8] sm:$0xff]  ;;  %v91_v4 = vld [vmem:[#allocation8 + $0x10] sm:$0xff]  ;;  %v92_v6 = vld [vmem:[#allocation8 + $0x18] sm:$0xff]  ;;  %vm93_vm1 = vcmask 261120   ;;  %s1285_s4 = smov 112   ;;  %s1286_s1 = smov 120  }
  0x5b   :  { %1038 = vmatprep.subr.mxu1 %v1284_v1  ;;  %1040 = vmatprep.mubr.msk.f32.mxu1 %vm1283_vm0, %v1284_v1  ;;  %v1090_v5 = vpack.c.bf16 %v90_v3, %v89_v2  ;;  %v1093_v7 = vpack.c.bf16 %v92_v6, %v91_v4  ;;  %v86_v8 = vld [vmem:[#allocation2] sm:$0xff]  ;;  %v87_v9 = vld [vmem:[#allocation5] sm:$0xff]  ;;  %v88_v10 = vld [vmem:[#allocation7] sm:$0xff]  ;;  %s1287_s9 = smov 104   ;;  %s1288_s3 = smov 64   ;;  %vm212_vm2 = vcmask 64512  }
  0x5c   :  { %s1289_s24 = smov 96   ;;  %s1290_s10 = smov 16   ;;  %vm870_vm3 = vcmask 130048   ;;  %vm872_vm4 = vcmask 195584  }
  0x5d   :  { %1091 = vmatpush3.bf16.msra.mxu0 %v1090_v5  ;;  %s1291_s11 = smov 24   ;;  %s1292_s13 = smov [#allocation11]  }
  0x5e   :  { %1092 = vmatprep.subr.bf16.mxu0 %v1282_v0  ;;  %s965_s14 = sshll.u32 %s1292_s13, 4  ;;  %s966_s14 = int_to_ptr.vmem [resolvable:$true] %s965_s14 }
  0x5f   :  { %s1245_s15 = scalar_lea.vmem %s966_s14, 128  ;;  %p1250_p13 = scmp.lt.s32.totalorder %s966_s14, %s966_s14 }
  0x60   :  { %p1246_p12 = scmp.ne.s32.totalorder %s966_s14, %s1245_s15  ;;  %p1251_p0 = scmp.lt.s32.totalorder %s1245_s15, %s1245_s15 }
  0x61   :  { %1094 = vmatpush3.bf16.msra.mxu0 %v1093_v7 }
  0x62   :  { %1068 = vmatprep.subr.mxu0 %v1284_v1  ;;  %p1252_p1 = por %p1251_p0, %p1250_p13 }
  0x64   :  { %1030 = vmatmul.mubr.msk.f32.vlgmr.msra.gmra.mrb[0].mxu0 %vm93_vm1, %v86_v8  ;;  %p1253_p2 = pnand %p1252_p1, %p1246_p12 }
  0x65   :  { %1032 = vmatprep.mubr.msk.f32.mxu0 %vm1283_vm0, %v1284_v1 }
  0x68   :  { %1033 = vmatmul.mubr.msk.f32.gmra.mrb[2].mxu0 %vm93_vm1, %v87_v9 }
  0x69   :  { %1035 = vmatprep.mubr.msk.f32.mxu0 %vm1283_vm0, %v1284_v1 }
  0x6c   :  { %1036 = vmatmul.mubr.msk.f32.gmra.mrb[4].mxu0 %vm93_vm1, %v88_v10 }
  0x6d   :  { %1070 = vmatprep.mubr.msk.f32.mxu0 %vm1283_vm0, %v1284_v1 }
 0x137   :  { %v1418_v11 = vpop.f32.mrb[0].mxu0 }
 0x138   :  { %v1031_v12 = vpop.f32.mrb[1].mxu0 }
 0x13b   :  { %v174_v13 = vpop.f32.mrb[2].mxu0 }
 0x13c   :  { %194 = vrot.lane.b32.xlu1 %v174_v13, %s1285_s4  ;;  %192 = vrot.lane.b32.xlu0 %v174_v13, %s1286_s1  ;;  %v1034_v14 = vpop.f32.mrb[3].mxu0 }
 0x13f   :  { %v179_v15 = vpop.f32.mrb[4].mxu0 }
 0x140   :  { %v183_v16 = vmul.f32 0.17677669, %v179_v15  ;;  %v1037_v17 = vpop.f32.mrb[5].mxu0 }
 0x142   :  { %187 = vrot.lane.b32.xlu1 %v183_v16, %s1285_s4  ;;  %185 = vrot.lane.b32.xlu0 %v183_v16, %s1286_s1 }
 0x146   :  { %189 = vrot.lane.b32.xlu1 %v183_v16, %s1287_s9  ;;  %196 = vrot.lane.b32.xlu0 %v174_v13, %s1287_s9 }
 0x14a   :  { %208 = vrot.lane.b32.xlu1 %v183_v16, %s1288_s3  ;;  %210 = vrot.lane.b32.xlu0 %v174_v13, %s1289_s24 }
 0x1ae   :  { %v193_v18 = vpop.permute.xlu0 %192  ;;  %v195_v19 = vpop.permute.xlu1 %194 }
 0x1af   :  { %289 = vrot.lane.b32.xlu0 %v193_v18, %s1289_s24 }
 0x1b3   :  { %367 = vrot.lane.b32.xlu0 %v195_v19, %s1289_s24  ;;  %v874_v19 = vld [vmem:[#allocation10] sm:$0xff] }
 0x1b4   :  { %v188_v20 = vpop.permute.xlu1 %187  ;;  %v186_v21 = vpop.permute.xlu0 %185 }
 0x1b5   :  { %287 = vrot.lane.b32.xlu1 %v186_v21, %s1288_s3 }
 0x1b8   :  { %v197_v22 = vpop.permute.xlu0 %196  ;;  %v190_v23 = vpop.permute.xlu1 %189 }
 0x1b9   :  { %365 = vrot.lane.b32.xlu1 %v188_v20, %s1288_s3  ;;  %445 = vrot.lane.b32.xlu0 %v197_v22, %s1289_s24  ;;  %v875_v20 = vld [vmem:[#allocation10 + $0x8] sm:$0xff]  ;;  %v876_v22 = vld [vmem:[#allocation10 + $0x10] sm:$0xff] }
 0x1ba   :  { %v1096_v21 = vpack.c.bf16 %v875_v20, %v874_v19 }
 0x1bc   :  { %v211_v24 = vpop.permute.xlu0 %210  ;;  %v209_v25 = vpop.permute.xlu1 %208 }
 0x1bd   :  { %443 = vrot.lane.b32.xlu1 %v190_v23, %s1288_s3  ;;  %1039 = vmatpush3.xpose.msk.msra.mxu1 %vm212_vm2, %v211_v24  ;;  %v877_v23 = vld [vmem:[#allocation10 + $0x18] sm:$0xff] }
 0x1be   :  { %1043 = vmatprep.subr.mxu1 %v1284_v1  ;;  %v1099_v24 = vpack.c.bf16 %v877_v23, %v876_v22 }
 0x1c0   :  { %1041 = vmatmul.mubr.msk.f32.vlgmr.msra.gmra.mrb[0].mxu1 %vm212_vm2, %v209_v25 }
 0x1c1   :  { %1045 = vmatprep.mubr.msk.f32.mxu1 %vm1283_vm0, %v1284_v1 }
 0x221   :  { %v290_v26 = vpop.permute.xlu0 %289 }
 0x222   :  { %1044 = vmatpush3.xpose.msk.msra.mxu1 %vm212_vm2, %v290_v26 }
 0x223   :  { %1048 = vmatprep.subr.mxu1 %v1284_v1 }
 0x225   :  { %v368_v27 = vpop.permute.xlu0 %367 }
 0x227   :  { %v288_v28 = vpop.permute.xlu1 %287 }
 0x228   :  { %1046 = vmatmul.mubr.msk.f32.vlgmr.msra.gmra.mrb[2].mxu1 %vm212_vm2, %v288_v28 }
 0x229   :  { %1049 = vmatpush3.xpose.msk.msra.mxu1 %vm212_vm2, %v368_v27  ;;  %1050 = vmatprep.mubr.msk.f32.mxu1 %vm1283_vm0, %v1284_v1 }
 0x22a   :  { %1053 = vmatprep.subr.mxu1 %v1284_v1 }
 0x22b   :  { %v366_v29 = vpop.permute.xlu1 %365  ;;  %v446_v30 = vpop.permute.xlu0 %445 }
 0x22c   :  { %1051 = vmatmul.mubr.msk.f32.vlgmr.msra.gmra.mrb[4].mxu1 %vm212_vm2, %v366_v29 }
 0x22d   :  { %1054 = vmatpush3.xpose.msk.msra.mxu1 %vm212_vm2, %v446_v30  ;;  %1055 = vmatprep.mubr.msk.f32.mxu1 %vm1283_vm0, %v1284_v1 }
 0x22e   :  { %1058 = vmatprep.subr.mxu1 %v1284_v1 }
 0x22f   :  { %v444_v31 = vpop.permute.xlu1 %443 }
 0x230   :  { %1056 = vmatmul.mubr.msk.f32.vlgmr.msra.gmra.mrb[6].mxu1 %vm212_vm2, %v444_v31 }
 0x231   :  { %1059 = vmatpush3.msra.mxu1 %v1418_v11  ;;  %1060 = vmatprep.mubr.msk.f32.mxu1 %vm1283_vm0, %v1284_v1 }
 0x232   :  { %1063 = vmatprep.subr.mxu1 %v1284_v1 }
 0x293   :  { %v283_v32 = vpop.f32.mrb[0].mxu1 }
 0x294   :  { %v1042_v33 = vpop.f32.mrb[1].mxu1  ;;  %v521_v34 = vsel %vm212_vm2, %v283_v32, -inf }
 0x295   :  { %522 = vmax.xlane.f32.xlu0 %v521_v34 }
 0x2fb   :  { %v361_v35 = vpop.f32.mrb[2].mxu1 }
 0x2fc   :  { %v1047_v36 = vpop.f32.mrb[3].mxu1  ;;  %v524_v37 = vsel %vm212_vm2, %v361_v35, -inf }
 0x2fd   :  { %525 = vmax.xlane.f32.xlu1 %v524_v37 }
 0x2ff   :  { %v439_v38 = vpop.f32.mrb[4].mxu1 }
 0x300   :  { %v1052_v39 = vpop.f32.mrb[5].mxu1  ;;  %v527_v40 = vsel %vm212_vm2, %v439_v38, -inf }
 0x301   :  { %528 = vmax.xlane.f32.xlu0 %v527_v40 }
 0x303   :  { %v517_v41 = vpop.f32.mrb[6].mxu1 }
 0x304   :  { %v1057_v42 = vpop.f32.mrb[7].mxu1  ;;  %v530_v43 = vsel %vm212_vm2, %v517_v41, -inf }
 0x305   :  { %531 = vmax.xlane.f32.xlu0 %v530_v43 }
 0x30e   :  { %199 = vrot.lane.b32.xlu1 %v1418_v11, %s1286_s1 }
 0x322   :  { %v523_v44 = vpop.xlane.xlu0 %522 }
 0x323   :  { %v533_v45 = vsub.f32 %v283_v32, %v523_v44 }
 0x325   :  { %v537_v46 = vmul.f32 1.442695, %v533_v45 }
 0x327   :  { %1119 = vpow2.f32 %v537_v46 }
 0x331   :  { %v1120_v47 = vpop.eup %1119 }
 0x332   :  { %v545_v48 = vsel %vm212_vm2, %v1120_v47, 0.0 }
 0x333   :  { %546 = vadd.xlane.f32.xlu1 %v545_v48 }
 0x38a   :  { %v526_v49 = vpop.xlane.xlu1 %525 }
 0x38b   :  { %v534_v50 = vsub.f32 %v361_v35, %v526_v49  ;;  %v991_v35 = vld [vmem:[%s1499_s5] ss:$0 sm:$0xff] }
 0x38d   :  { %v539_v51 = vmul.f32 1.442695, %v534_v50 }
 0x38e   :  { %v529_v52 = vpop.xlane.xlu0 %528  ;;  %v200_v2 = vpop.permute.xlu1 %199 }
 0x38f   :  { %1121 = vpow2.f32 %v539_v51  ;;  %v535_v53 = vsub.f32 %v439_v38, %v529_v52 }
 0x391   :  { %v541_v54 = vmul.f32 1.442695, %v535_v53 }
 0x392   :  { %v532_v55 = vpop.xlane.xlu0 %531 }
 0x393   :  { %1123 = vpow2.f32 %v541_v54  ;;  %v536_v56 = vsub.f32 %v517_v41, %v532_v55 }
 0x395   :  { %v543_v57 = vmul.f32 1.442695, %v536_v56 }
 0x397   :  { %1125 = vpow2.f32 %v543_v57 }
 0x399   :  { %v1122_v58 = vpop.eup %1121 }
 0x39a   :  { %v548_v59 = vsel %vm212_vm2, %v1122_v58, 0.0 }
 0x39b   :  { %549 = vadd.xlane.f32.xlu0 %v548_v59 }
 0x39d   :  { %v1124_v60 = vpop.eup %1123 }
 0x39e   :  { %v551_v61 = vsel %vm212_vm2, %v1124_v60, 0.0 }
 0x39f   :  { %552 = vadd.xlane.f32.xlu1 %v551_v61 }
 0x3a1   :  { %v1126_v62 = vpop.eup %1125 }
 0x3a2   :  { %v554_v63 = vsel %vm212_vm2, %v1126_v62, 0.0 }
 0x3a3   :  { %555 = vadd.xlane.f32.xlu0 %v554_v63 }
 0x3b0   :  { %205 = vrot.lane.b32.xlu1 %v1418_v11, %s1287_s9 }
 0x3b9   :  { %202 = vrot.lane.b32.xlu0 %v1418_v11, %s1285_s4 }
 0x3c0   :  { %v547_v3 = vpop.xlane.xlu1 %546 }
 0x3c1   :  { %1127 = vrcp.f32 %v547_v3 }
 0x3cb   :  { %v1128_v4 = vpop.eup %1127 }
 0x3cc   :  { %v558_v5 = vmul.f32 %v1128_v4, %v1120_v47 }
 0x3ce   :  { %1061 = vmatmul.mubr.msk.f32.vlgmr.msra.gmra.mrb[8].mxu1 %vm212_vm2, %v558_v5 }
 0x3cf   :  { %1064 = vmatpush3.msra.mxu1 %v200_v2  ;;  %1065 = vmatprep.mubr.msk.f32.mxu1 %vm1283_vm0, %v1284_v1 }
 0x3d0   :  { %1073 = vmatprep.subr.mxu1 %v1284_v1 }
 0x428   :  { %v550_v6 = vpop.xlane.xlu0 %549 }
 0x429   :  { %1129 = vrcp.f32 %v550_v6 }
 0x42c   :  { %v553_v7 = vpop.xlane.xlu1 %552 }
 0x42d   :  { %1131 = vrcp.f32 %v553_v7 }
 0x430   :  { %v556_v8 = vpop.xlane.xlu0 %555  ;;  %v206_v12 = vpop.permute.xlu1 %205 }
 0x431   :  { %1133 = vrcp.f32 %v556_v8 }
 0x433   :  { %v1130_v9 = vpop.eup %1129 }
 0x434   :  { %v560_v10 = vmul.f32 %v1130_v9, %v1122_v58  ;;  %v203_v11 = vpop.permute.xlu0 %202 }
 0x435   :  { %1069 = vmatpush3.msra.mxu0 %v203_v11 }
 0x436   :  { %1066 = vmatmul.mubr.msk.f32.vlgmr.msra.gmra.mrb[10].mxu1 %vm212_vm2, %v560_v10  ;;  %1095 = vmatprep.subr.bf16.mxu0 %v1282_v0 }
 0x437   :  { %v1132_v13 = vpop.eup %1131  ;;  %1074 = vmatpush3.msra.mxu1 %v206_v12  ;;  %1075 = vmatprep.mubr.msk.f32.mxu1 %vm1283_vm0, %v1284_v1 }
 0x438   :  { %v562_v14 = vmul.f32 %v1132_v13, %v1124_v60 }
 0x43a   :  { %1071 = vmatmul.mubr.msk.f32.vlgmr.msra.gmra.mrb[6].mxu0 %vm212_vm2, %v562_v14 }
 0x43b   :  { %v1134_v15 = vpop.eup %1133  ;;  %1086 = vmatprep.mubr.msk.f32.mxu0 %vm1283_vm0, %v1284_v1  ;;  %1097 = vmatpush3.bf16.msra.mxu0 %v1096_v21 }
 0x43c   :  { %v564_v16 = vmul.f32 %v1134_v15, %v1126_v62  ;;  %1098 = vmatprep.subr.bf16.mxu0 %v1282_v0 }
 0x43e   :  { %1076 = vmatmul.mubr.msk.f32.vlgmr.msra.gmra.mrb[12].mxu1 %vm212_vm2, %v564_v16 }
 0x43f   :  { %1100 = vmatpush3.bf16.msra.mxu0 %v1099_v24 }
 0x4a1   :  { %v634_v17 = vpop.f32.mrb[8].mxu1 }
 0x4a2   :  { %v1062_v18 = vpop.f32.mrb[9].mxu1 }
 0x509   :  { %v707_v25 = vpop.f32.mrb[10].mxu1 }
 0x50a   :  { %858 = vrot.lane.b32.xlu1 %v707_v25, %s1278_s19  ;;  %v1067_v26 = vpop.f32.mrb[11].mxu1 }
 0x50d   :  { %v780_v1 = vpop.f32.mrb[6].mxu0 }
 0x50e   :  { %862 = vrot.lane.b32.xlu0 %v780_v1, %s1290_s10  ;;  %v1072_v27 = vpop.f32.mrb[7].mxu0 }
 0x511   :  { %v853_v28 = vpop.f32.mrb[12].mxu1 }
 0x512   :  { %866 = vrot.lane.b32.xlu1 %v853_v28, %s1291_s11  ;;  %v1077_v29 = vpop.f32.mrb[13].mxu1 }
 0x57c   :  { %v859_v30 = vpop.permute.xlu1 %858 }
 0x57d   :  { %v869_v0 = vsel %vm212_vm2, %v634_v17, %v859_v30 }
 0x580   :  { %v863_v31 = vpop.permute.xlu0 %862 }
 0x581   :  { %v871_v32 = vsel %vm870_vm3, %v869_v0, %v863_v31 }
 0x584   :  { %v867_v33 = vpop.permute.xlu1 %866 }
 0x585   :  { %v873_v34 = vsel %vm872_vm4, %v871_v32, %v867_v33 }
 0x586   :  { %1087 = vmatmul.mubr.msk.f32.vlgmr.msra.gmra.mrb[8].mxu0 %vm93_vm1, %v873_v34 }
 0x659   :  { %v954_v36 = vpop.f32.mrb[8].mxu0 }
 0x65a   :  { %v955_v37 = vadd.f32 %v991_v35, %v954_v36  ;;  %v1088_v38 = vpop.f32.mrb[9].mxu0 }
 0x65c   :  { %958 = vst.msk [vmem:[#allocation11] sm:$0xff] %vm93_vm1, %v955_v37 }
 0x65d   :  { %1256 = shalt.err (!%p1253_p2)
}
 0x65e   :  { %s1257_s18 = scalar_lea.hbm %s1500_s6, 128 }
 0x65f   :  { %p1258_p3 = scmp.ne.s32.totalorder %s1500_s6, %s1257_s18  ;;  %p1261_p4 = scmp.lt.u32.totalorder %s1257_s18, %s1500_s6 }
 0x661   :  { %p1263_p5 = pnand %p1261_p4, %p1258_p3 }
 0x663   :  { %1266 = shalt.err (!%p1263_p5)
}
 0x664   :  { %968 = dma.vmem_to_hbm [thread:$0]  %s966_s14, 128, %s1500_s6, [#allocation4]  }
 0x665   :  { %1273 = dma.done.wait [#allocation4], 128  }
 0x666   :  { %1274 = vsyncadd [#allocation4], 4294967168 }
 0x667   :  { %972 = vsyncpa [#allocation3], 1 }
 0x668   :  { %973 = vsyncpa [#allocation6], 1 }
 0x669   :  { %974 = vsyncpa [#allocation9], 1 }
 0x66a   :  { %975 = vsyncpa [#allocation4], 1 }

</bundles_post_ra>
